<compile_context>
chip_gen: v7x
topology: tpu7x:2x2x1
jax: 0.10.0
libtpu: 0.0.40
codegen_flags: <defaults>
</compile_context>

<pallas_src>
import jax
import jax.numpy as jnp
from jax.experimental import pallas as pl
from jax.experimental.pallas import tpu as pltpu


def _cdiv(a, b):
    return -(-a // b)


def _aconc_kernel(x_ref, prm_ref, o_ref):
    x = x_ref[...]                     # (tr, tl) activation tile
    prm = prm_ref[...]                 # (tr, 3): [dp, beta*dp, p2] per row
    dp = prm[:, 0:1]                   # (tr, 1) broadcast over lanes
    bdp = prm[:, 1:2]
    p2 = prm[:, 2:3]
    o_ref[...] = x * (dp * jax.nn.sigmoid(bdp * x) + p2)


def aconc_pallas(x_nchw, p1, p2, beta, *, target_tile_bytes=None,
                 donate_input=False):
    """x_nchw: (N, C, H, W); p1/p2/beta: (1, C, 1, 1). Returns (N, C, H, W)."""
    N, C, H, W = x_nchw.shape
    R, L = N * C, H * W
    dtype = x_nchw.dtype
    bpe = jnp.dtype(dtype).itemsize
    sub = max(8, 32 // bpe)            # sublane multiple: f32->8, bf16->16, i8->32

    # ---- generation-aware budgets -------------------------------------------
    try:
        vmem_cap = int(pltpu.get_tpu_info().vmem_capacity_bytes)
    except Exception:
        vmem_cap = 64 << 20            # conservative default (v7x per-TC)
    big_vmem = vmem_cap >= (96 << 20)  # v5e/v6e (128 MiB) vs v7x (64 MiB)
    if target_tile_bytes is None:
        target_tile_bytes = (6 << 20) if big_vmem else (2 << 20)

    # ---- tile selection ------------------------------------------------------
    # Lane tile: full L unless even a minimal-height full-L tile busts the
    # budget and L can be split on 128-lane boundaries.
    if L % 128 == 0 and L * sub * bpe > target_tile_bytes:
        tl = min(L, max(128, ((target_tile_bytes // (sub * bpe)) // 128) * 128))
    else:
        tl = L  # full-extent lane block (masked stores if L % 128 != 0)
        # TODO(synk): for H*W like 7*7 / 14*14 (non-128-multiple), pad L to a
        # 128 multiple in the wrapper to avoid masked vst.msk partial stores.

    rows_fit = max(1, target_tile_bytes // (tl * bpe))
    tr = min(R, max(sub, (rows_fit // sub) * sub)) if R >= sub else R

    # Never collapse to a single grid step: aim for >= 4 steps (>= 2 per TC on
    # dual-core chips) so the DMA pipeline has something to overlap.
    def _steps(tr_, tl_):
        return _cdiv(R, tr_) * _cdiv(L, tl_)

    MIN_STEPS = 4
    while _steps(tr, tl) < MIN_STEPS and tr >= 2 * sub:
        tr = max(sub, ((tr // 2) // sub) * sub)
    while _steps(tr, tl) < MIN_STEPS and L % 128 == 0 and tl >= 256:
        tl = max(128, ((tl // 2) // 128) * 128)

    # Lane axis last (fastest): the packed-param block index is constant
    # across lane steps, so it is not re-DMA'd.
    grid = (_cdiv(R, tr), _cdiv(L, tl))

    # ---- packed per-row params: [dp, beta*dp, p2] ---------------------------
    p1c = p1.reshape(C).astype(dtype)
    p2c = p2.reshape(C).astype(dtype)
    bc = beta.reshape(C).astype(dtype)
    dpc = p1c - p2c
    prm_c = jnp.stack([dpc, bc * dpc, p2c], axis=-1)   # (C, 3)
    prm_r = jnp.tile(prm_c, (N, 1))                    # (R, 3); row n*C+c -> channel c

    # ---- VMEM accounting (double-buffered; param block lane-pads to 128) ----
    tile_bytes = tr * tl * bpe
    prm_bytes = tr * 128 * bpe
    needed = 2 * (2 * tile_bytes + prm_bytes)
    vmem_limit = int(min(max(needed + (2 << 20), 32 << 20),
                         vmem_cap - (16 << 20)))

    x2d = x_nchw.reshape(R, L)          # metadata-only view

    out2d = pl.pallas_call(
        _aconc_kernel,
        out_shape=jax.ShapeDtypeStruct((R, L), dtype),
        grid_spec=pltpu.PrefetchScalarGridSpec(
            num_scalar_prefetch=0,
            grid=grid,
            in_specs=[
                pl.BlockSpec((tr, tl), lambda i, j: (i, j)),  # x tile (lane-dense)
                pl.BlockSpec((tr, 3), lambda i, j: (i, 0)),   # packed params (row-only)
            ],
            out_specs=pl.BlockSpec((tr, tl), lambda i, j: (i, j)),
        ),
        compiler_params=pltpu.CompilerParams(
            # TODO(synk): on v7x, verify the row axis is actually sharded
            # across both TensorCores; if not, switch it to pltpu.CORE_PARALLEL.
            dimension_semantics=("parallel", "parallel"),
            vmem_limit_bytes=vmem_limit,
        ),
        input_output_aliases=({0: 0} if donate_input else {}),
    )(x2d, prm_r)

    # Metadata-only reshape back to NCHW.
    return out2d.reshape(N, C, H, W)


def aconc_ref(x, p1, p2, beta):
    """Pure-JAX reference matching the PyTorch forward (NCHW broadcast)."""
    d = p1 * x - p2 * x
    return d * jax.nn.sigmoid(beta * d) + p2 * x


if __name__ == "__main__":
    key = jax.random.PRNGKey(0)
    kx, kp1, kp2 = jax.random.split(key, 3)

    N, C, H, W = 2, 4, 16, 16
    x = jax.random.normal(kx, (N, C, H, W), dtype=jnp.float32)

    # Deterministic params mirroring torch.randn / torch.ones shapes.
    p1 = jax.random.normal(kp1, (1, C, 1, 1), dtype=jnp.float32)
    p2 = jax.random.normal(kp2, (1, C, 1, 1), dtype=jnp.float32)
    beta = jnp.ones((1, C, 1, 1), dtype=jnp.float32)

    out = jax.block_until_ready(aconc_pallas(x, p1, p2, beta))
    ref = aconc_ref(x, p1, p2, beta)

    assert out.shape == (N, C, H, W)
    assert jnp.allclose(out, ref, atol=1e-5, rtol=1e-5), "mismatch vs reference"
    print("KERNEL_OK")
</pallas_src>

<mosaic_0001>
module attributes {stable_mosaic.version = 11 : i64} {
  func.func @_aconc_kernel(%arg0: i32, %arg1: i32, %arg2: memref<8x128xf32, #tpu.memory_space<vmem>>, %arg3: memref<8x3xf32, #tpu.memory_space<vmem>>, %arg4: memref<8x128xf32, #tpu.memory_space<vmem>>) attributes {dimension_semantics = [#tpu.dimension_semantics<parallel>, #tpu.dimension_semantics<parallel>], iteration_bounds = array<i64: 1, 2>, scalar_prefetch = 0 : i64, scratch_operands = 0 : i64, tpu.core_type = #tpu.core_type<tc>, window_params = [{transform_indices = @transform_0, window_bounds = array<i64: 8, 128>}, {transform_indices = @transform_1, window_bounds = array<i64: 8, 3>}, {transform_indices = @transform_2, window_bounds = array<i64: 8, 128>}]} {
    %c0 = arith.constant 0 : index
    %c0_0 = arith.constant 0 : index
    %0 = vector.load %arg2[%c0, %c0_0] : memref<8x128xf32, #tpu.memory_space<vmem>>, vector<8x128xf32>
    %c0_1 = arith.constant 0 : index
    %c0_2 = arith.constant 0 : index
    %1 = vector.load %arg3[%c0_1, %c0_2] : memref<8x3xf32, #tpu.memory_space<vmem>>, vector<8x3xf32>
    %2 = vector.extract_strided_slice %1 {offsets = [0, 0], sizes = [8, 1], strides = [1, 1]} : vector<8x3xf32> to vector<8x1xf32>
    %3 = vector.extract_strided_slice %1 {offsets = [0, 1], sizes = [8, 1], strides = [1, 1]} : vector<8x3xf32> to vector<8x1xf32>
    %4 = vector.extract_strided_slice %1 {offsets = [0, 2], sizes = [8, 1], strides = [1, 1]} : vector<8x3xf32> to vector<8x1xf32>
    %5 = vector.broadcast %3 : vector<8x1xf32> to vector<8x128xf32>
    %6 = arith.mulf %5, %0 : vector<8x128xf32>
    %7 = arith.negf %6 : vector<8x128xf32>
    %8 = math.exp %7 : vector<8x128xf32>
    %cst = arith.constant 1.000000e+00 : f32
    %9 = vector.broadcast %cst : f32 to vector<8x128xf32>
    %10 = arith.addf %9, %8 : vector<8x128xf32>
    %11 = arith.divf %9, %10 : vector<8x128xf32>
    %12 = vector.broadcast %2 : vector<8x1xf32> to vector<8x128xf32>
    %13 = arith.mulf %12, %11 : vector<8x128xf32>
    %14 = vector.broadcast %4 : vector<8x1xf32> to vector<8x128xf32>
    %15 = arith.addf %13, %14 : vector<8x128xf32>
    %16 = arith.mulf %0, %15 : vector<8x128xf32>
    %c0_3 = arith.constant 0 : index
    %c0_4 = arith.constant 0 : index
    %17 = vector.load %arg4[%c0_3, %c0_4] : memref<8x128xf32, #tpu.memory_space<vmem>>, vector<8x128xf32>
    tpu.vector_store %arg4[%c0_3, %c0_4], %16 {strides = array<i32>} : memref<8x128xf32, #tpu.memory_space<vmem>>, vector<8x128xf32>,
    return
  }
  func.func @transform_0(%arg0: i32, %arg1: i32) -> (i32, i32) {
    %c0_i32 = arith.constant 0 : i32
    return %arg0, %arg1 : i32, i32
  }
  func.func @transform_1(%arg0: i32, %arg1: i32) -> (i32, i32) {
    %c0_i32 = arith.constant 0 : i32
    %c0_i32_0 = arith.constant 0 : i32
    return %arg0, %c0_i32 : i32, i32
  }
  func.func @transform_2(%arg0: i32, %arg1: i32) -> (i32, i32) {
    %c0_i32 = arith.constant 0 : i32
    return %arg0, %arg1 : i32, i32
  }
}

</mosaic_0001>

<bundles_post_ra>
// kernel: tpu_custom_call.1
= control target key start
LH: loop header
LB: loop body
LE: loop exit
PB: predicated region body
PF: predicated region fallthrough
CT: control target
= control target key end

     0   :  { %7 = vsyncpa [#allocation3], 0  ;;  %s730_s0 = inlined_call_operand.hbm [shape: f32[8,256], index: 0, kind: input, shape index: {}]   ;;  %s731_s1 = inlined_call_operand.vmem [shape: f32[8,3], index: 1, kind: input, shape index: {}]   ;;  %s732_s2 = inlined_call_operand.hbm [shape: f32[8,256], index: 2, kind: output, shape index: {}]  }
   0x1   :  { %9 = vsyncpa [#allocation3 + $0x1], 0 }
   0x2   :  { %10 = vsyncpa [#allocation4], 0 }
   0x3   :  { %12 = vsyncpa [#allocation4 + $0x1], 0  ;;  %s555_s9 = smov 0   ;;  %s557_s10 = smov 0  }
   0x4   :  { %s559_s11 = smov 0   ;;  %s561_s12 = smov 0  }
   0x5   :  { %s563_s13 = smov 0   ;;  %s565_s14 = smov 0  }
   0x6 LB: > { %s333_s15 = sadd.s32 4294967295, %s533_s14   ;;  %s334_s16 = sadd.s32 4294967294, %s533_s14   ;;  %s533_s14 = sphi %s565_s14, %s18_s14   ;;  %s529_s13 = sphi %s563_s13, %s748_s13   ;;  %s525_s12 = sphi %s561_s12, %s747_s12   ;;  %s521_s11 = sphi %s559_s11, %s746_s11   ;;  %s517_s10 = sphi %s557_s10, %s745_s10   ;;  %s513_s9 = sphi %s555_s9, %s744_s9  }
   0x7   : > { %s27_s17 = sadd.s32 1, %s529_s13  ;;  %s39_s18 = sadd.s32 1, %s521_s11 }
   0x8   : > { %p28_p0 = scmp.ge.s32.totalorder %s27_s17, 2  ;;  %p46_p1 = scmp.ne.s32.totalorder %s521_s11, %s517_s10 }
   0x9   : > { %p47_p2 = scmp.eq.s32.totalorder %s533_s14, 0  ;;  %p52_p3 = scmp.ne.s32.totalorder %s517_s10, %s513_s9 }
   0xa   : > { %s750_s17 = smov (%p28_p0, %s27_s17), 0  ;;  %p53_p5 = scmp.eq.s32.totalorder %s333_s15, 0 }
   0xb   : > { %p596_p4 = por %p47_p2, %p46_p1  ;;  %s35_s20 = ssub.s32 %s529_s13, %s750_s17 }
   0xc   : > { %p104_p6 = scmp.eq.s32.totalorder %s333_s15, 1  ;;  %p37_p7 = scmp.eq.s32.totalorder %s35_s20, 0 }
   0xd   : > { %p602_p8 = por %p53_p5, %p52_p3  ;;  %p110_p10 = scmp.eq.s32.totalorder %s334_s16, 1 }
   0xe   : > { %p606_p9 = por %p104_p6, %p46_p1  ;;  %p360_p13 = scmp.lt.s32.totalorder %s533_s14, 2 }
   0xf   : > { %s611_s23 = scalar_select %p37_p7, %s521_s11, %s39_s18  }
  0x10   : > { %s736_s22 = scalar_select %p606_p9, 1, 0 }
  0x11   : > { %p613_p11 = por %p110_p10, %p52_p3  ;;  %s137_s25 = sand.u32 1, %s521_s11  }
  0x12   : > { %s338_s26 = sshll.u32 %s137_s25, 3  ;;  %s339_s27 = sshll.u32 %s529_s13, 7 }
  0x13   : > { %s737_s24 = scalar_select %p613_p11, 1, 0 }
  0x14   : > { %s624_s30 = scalar_lea.hbm %s730_s0, %s339_s27  ;;  %s141_s3 = scalar_lea.vmem [#allocation2], %s338_s26 }
  0x15   : > { %s150_s4 = sshll.u32 %s141_s3, 4  ;;  %p630_p0 = pnand %p360_p13, %p596_p4  ;;  %s626_s4 = int_to_ptr.vmem [resolvable:$true] %s150_s4 }
  0x16   : > { %s138_s6 = scalar_lea.sflag [#allocation3], %s137_s25  ;;  %s421_s7 = scalar_lea.hbm %s624_s30, 128 }
  0x17   : > { %p422_p3 = scmp.ne.s32.totalorder %s624_s30, %s421_s7  ;;  %p423_p5 = pneg %p630_p0 }
  0x18   : > { %s426_s16 = scalar_lea.hbm %s730_s0, 256  ;;  %p427_p4 = scmp.lt.u32.totalorder %s624_s30, %s730_s0 }
  0x19   : > { %p424_p6 = pnand %p423_p5, %p422_p3  ;;  %p428_p10 = scmp.lt.u32.totalorder %s426_s16, %s421_s7 }
  0x1a   : > { %p430_p12 = scmp.lt.u32.totalorder %s421_s7, %s624_s30 }
  0x1b   : > { %p425_p7 = pneg %p424_p6  ;;  %p429_p13 = por %p428_p10, %p427_p4 }
  0x1d   : > { %p431_p1 = por %p430_p12, %p429_p13 }
  0x1f   : > { %p432_p2 = pnand %p431_p1, %p425_p7 }
  0x21   : > { %435 = shalt.err (!%p432_p2)
}
  0x22   : > { %s436_s20 = scalar_lea.vmem %s626_s4, 128  ;;  %s535_s25 = smov [#allocation2]  }
  0x23   : > { %p437_p3 = scmp.ne.s32.totalorder %s626_s4, %s436_s20  ;;  %s441_s26 = sshll.u32 %s535_s25, 4  ;;  %s442_s26 = int_to_ptr.vmem [resolvable:$false] %s441_s26 }
  0x24   : > { %s443_s27 = scalar_lea.vmem %s442_s26, 256  ;;  %p444_p9 = scmp.lt.s32.totalorder %s626_s4, %s442_s26 }
  0x25   : > { %p439_p6 = pnand %p437_p3, %p423_p5  ;;  %p445_p4 = scmp.lt.s32.totalorder %s443_s27, %s436_s20 }
  0x27   : > { %p440_p11 = pneg %p439_p6  ;;  %p446_p10 = por %p445_p4, %p444_p9 }
  0x29   : > { %p447_p12 = pnand %p446_p10, %p440_p11 }
  0x2b   : > { %450 = shalt.err (!%p447_p12)
}
  0x2c   : > { %355 = dma.hbm_to_vmem [thread:$0]  (!%p630_p0), %s624_s30, 128, %s626_s4, %s138_s6  }
  0x2d   : > { %p739_p1 = scmp.lt.s32.totalorder %s533_s14, 3  ;;  %p740_p2 = scmp.ge.s32.totalorder %s533_s14, 1 }
  0x2f   : > { %p156_p5 = pnand %p740_p2, %p739_p1 }
  0x30   : > { %s666_s28 = sand.u32 (!%p156_p5), 1, %s517_s10  }
  0x31   : > { %159 = sbr.rel (%p156_p5) target bundleno = 235 (0xeb), region = 28  ;;  %s341_s29 = sshll.u32 (!%p156_p5), %s666_s28, 3 }
  0x32   : > { %s162_s3 = scalar_lea.sflag (!%p156_p5), [#allocation3], %s666_s28  ;;  %s165_s7 = scalar_lea.vmem (!%p156_p5), [#allocation2], %s341_s29 }
  0x38   : > { %504 = dma.done.wait (%p602_p8), %s162_s3, 128  }
  0x39   : > { %506 = vsyncadd (%p602_p8), %s162_s3, 4294967168  ;;  %v536_v0 = vmov 1   ;;  %v537_v1 = vmov 2   ;;  %v195_v2 = vld [vmem:[%s731_s1] sm:$0xff]  ;;  %v538_v3 = vmov 0   ;;  %s345_s21 = sshll.u32 %s525_s12, 7 }
  0x3a   : > { %413 = vset.pattern.permute.xlu0 %v536_v0  ;;  %415 = vset.pattern.permute.xlu1 %v537_v1  ;;  %v194_v4 = vld [vmem:[%s165_s7] sm:$0xff]  ;;  %s189_s5 = scalar_lea.vmem [#allocation5], %s341_s29  ;;  %s681_s16 = scalar_lea.hbm %s732_s2, %s345_s21 }
  0x3b   : > { %198 = vperm.xlu0 %413, %v195_v2   ;;  %214 = vperm.xlu1 %415, %v195_v2   ;;  %s236_s6 = sshll.u32 %s189_s5, 4  ;;  %s221_s18 = scalar_lea.sflag [#allocation4], %s666_s28  ;;  %s683_s6 = int_to_ptr.vmem [resolvable:$true] %s236_s6 }
  0x3c   : > { %s451_s19 = scalar_lea.vmem %s683_s6, 128  ;;  %p741_p9 = scmp.ne.s32.totalorder %s736_s22, 0 }
  0x3d   : > { %p452_p8 = scmp.ne.s32.totalorder %s683_s6, %s451_s19  ;;  %s539_s12 = smov [#allocation5]  }
  0x3e   : > { %s455_s20 = sshll.u32 %s539_s12, 4  ;;  %s456_s20 = int_to_ptr.vmem [resolvable:$false] %s455_s20 }
  0x3f   : > { %414 = vset.pattern.permute.xlu0 %v538_v3  ;;  %p453_p11 = pnand %p452_p8, %p741_p9  ;;  %s457_s25 = scalar_lea.vmem %s456_s20, 256 }
  0x40   : > { %209 = vperm.xlu0 %414, %v195_v2   ;;  %p458_p7 = scmp.lt.s32.totalorder %s683_s6, %s456_s20  ;;  %p459_p13 = scmp.lt.s32.totalorder %s457_s25, %s451_s19 }
  0x41   : > { %p454_p0 = pneg %p453_p11 }
  0x42   : > { %p460_p3 = por %p459_p13, %p458_p7 }
  0x44   : > { %416 = vset.pattern.permute.xlu0 %v537_v1  ;;  %p461_p6 = pnand %p460_p3, %p454_p0 }
  0xba   : > { %v199_v5 = vpop.permute.xlu0 %198  ;;  %v215_v12 = vpop.permute.xlu1 %214 }
  0xbb   : > { %v201_v6 = vmul.f32 %v199_v5, %v194_v4 }
  0xbd   : > { %v343_v7 = vmul.f32 -1.442695, %v201_v6 }
  0xbf   : > { %417 = vpow2.f32 %v343_v7  ;;  %v210_v10 = vpop.permute.xlu0 %209 }
  0xc9   : > { %v418_v8 = vpop.eup %417 }
  0xca   : > { %v205_v9 = vadd.f32 1.0, %v418_v8 }
  0xcc   : > { %419 = vrcp.f32 %v205_v9 }
  0xd6   : > { %v420_v11 = vpop.eup %419 }
  0xd7   : > { %v212_v13 = vmul.f32 %v420_v11, %v210_v10 }
  0xd9   : > { %v217_v14 = vadd.f32 %v215_v12, %v212_v13 }
  0xdb   : > { %v218_v15 = vmul.f32 %v217_v14, %v194_v4 }
  0xdd   : > { %219 = vst [vmem:[%s189_s5] sm:$0xff] %v218_v15 }
  0xde   : > { %464 = shalt.err (!%p461_p6)
}
  0xdf   : > { %s465_s26 = scalar_lea.hbm %s681_s16, 128  ;;  %s469_s29 = scalar_lea.hbm %s732_s2, 256 }
  0xe0   : > { %p466_p4 = scmp.ne.s32.totalorder %s681_s16, %s465_s26  ;;  %p470_p1 = scmp.lt.u32.totalorder %s681_s16, %s732_s2 }
  0xe1   : > { %p471_p2 = scmp.lt.u32.totalorder %s469_s29, %s465_s26  ;;  %p473_p8 = scmp.lt.u32.totalorder %s465_s26, %s681_s16 }
  0xe2   : > { %p467_p10 = pnand %p466_p4, %p741_p9 }
  0xe3   : > { %p472_p5 = por %p471_p2, %p470_p1 }
  0xe4   : > { %p468_p12 = pneg %p467_p10 }
  0xe5   : > { %p474_p11 = por %p473_p8, %p472_p5 }
  0xe7   : > { %p475_p0 = pnand %p474_p11, %p468_p12 }
  0xe9   : > { %478 = shalt.err (!%p475_p0)
}
  0xea   : > { %350 = dma.vmem_to_hbm [thread:$0]  (%p741_p9), %s683_s6, 128, %s681_s16, %s221_s18  }
  0xeb PF: > { %s248_s30 = sand.u32 1, %s513_s9   ;;  %p742_p7 = scmp.ne.s32.totalorder %s737_s24, 0 }
  0xec   : > { %p743_p13 = scmp.ge.s32.totalorder %s533_s14, 2  ;;  %s249_s4 = scalar_lea.sflag [#allocation4], %s248_s30 }
  0xee   : > { %p357_p3 = pnand %p743_p13, %p742_p7 }
  0xf0   : > { %508 = dma.done.wait (!%p357_p3), %s249_s4, 128  }
  0xf1   : > { %510 = vsyncadd (!%p357_p3), %s249_s4, 4294967168  ;;  %s18_s14 = sadd.s32 1, %s533_s14   ;;  %s744_s9 = smov %s517_s10 }
  0xf2   : > { %p15_p6 = scmp.ge.s32.totalorder %s18_s14, 4   ;;  %s745_s10 = smov %s521_s11 }
  0xf3   : > { %s746_s11 = smov %s611_s23  ;;  %s747_s12 = smov %s529_s13 }
  0xf4   : > { %s748_s13 = smov %s750_s17  ;;  %17 = sbr.rel (!%p15_p6) target bundleno = 6 (0x6), region = 76 }
  0xfb   :  { %254 = vsyncpa [#allocation3], 1 }
  0xfc   :  { %256 = vsyncpa [#allocation3 + $0x1], 1 }
  0xfd   :  { %257 = vsyncpa [#allocation4], 1 }
  0xfe   :  { %259 = vsyncpa [#allocation4 + $0x1], 1 }

</bundles_post_ra>
